<compile_context>
chip_gen: v7x
topology: tpu7x:2x2x1
jax: 0.10.0
libtpu: 0.0.40
codegen_flags: <defaults>
</compile_context>

<pallas_src>
import numpy as np
import jax
import jax.numpy as jnp
from jax import lax
from jax.experimental import pallas as pl
from jax.experimental.pallas import tpu as pltpu


# ----------------------------------------------------------------------------
# Deterministic parameter construction (mirrors Lanczos.get_kernel / __init__)
# ----------------------------------------------------------------------------
def get_kernel(factor, kernel_width, support=1):
    kernel = np.zeros([kernel_width, kernel_width])
    center = kernel_width / 2.0
    pi2 = np.pi * np.pi
    for i in range(kernel.shape[0]):
        for j in range(kernel.shape[1]):
            di = abs(i - center) / factor
            dj = abs(j - center) / factor
            val = 1
            if di != 0:
                val *= support * np.sin(np.pi * di) * np.sin(np.pi * di / support) / (pi2 * di * di)
            if dj != 0:
                val *= support * np.sin(np.pi * dj) * np.sin(np.pi * dj / support) / (pi2 * dj * dj)
            kernel[i][j] = val
    kernel /= kernel.sum()
    return kernel


def _round_up(a, b):
    return ((a + b - 1) // b) * b


def _divisors(n):
    return [d for d in range(1, n + 1) if n % d == 0]


# ----------------------------------------------------------------------------
# Forward pass: ReplicationPad2d + depthwise strided conv (Pallas VPU kernel)
# ----------------------------------------------------------------------------
def make_lanczos(in_d, factor, kernel_width, support=1):
    """Returns a jitted forward(x) equivalent to Lanczos(in_d, factor, kernel_width, support)."""
    k2d = get_kernel(factor, kernel_width, support).astype(np.float32)  # torch f64 -> f32 weight cast
    KH, KW = k2d.shape
    s = int(factor)
    pad = (KH - 1) // 2 if KH % 2 == 1 else (KH - s) // 2
    dh_span = (KH - 1) // s          # max vertical in-phase tap offset
    dw_span = (KW - 1) // s          # max horizontal in-phase tap offset

    # Group taps sharing the exact same f32 weight: sum the taps first, multiply once.
    groups = {}
    for kh in range(KH):
        for kw in range(KW):
            w = float(k2d[kh, kw])
            if w == 0.0:
                continue
            groups.setdefault(w, []).append((kh, kw))
    weight_groups = list(groups.items())
    needed_phases = sorted({(kh % s, kw % s) for taps in groups.values() for (kh, kw) in taps})

    BLOCK_BUDGET = 4 * 1024 * 1024   # per-step input block: safe middle ground for v5e/v6e/v7x
    LIVE_BUDGET = 128 * 1024         # ~32 vregs of live values per in-kernel row chunk

    @jax.jit
    def forward(x):
        x = x.astype(jnp.float32)
        N, C, H, W = x.shape
        assert C == in_d
        NC = N * C

        Hp, Wp = H + 2 * pad, W + 2 * pad
        Ho = (Hp - KH) // s + 1
        Wo = (Wp - KW) // s + 1
        Hps, Wps = _round_up(Hp, s), _round_up(Wp, s)
        Hq, Wq = Hps // s, Wps // s
        # All in-kernel slices stay inside the phase planes.
        assert Ho + dh_span <= Hq and Wo + dw_span <= Wq

        # --- channel grouping: pack nc_lane channels side-by-side on the lane axis ---
        per_chan_bytes = Hps * Wps * 4
        cap = max(1, BLOCK_BUDGET // per_chan_bytes)
        cands = [d for d in _divisors(NC) if d <= cap] or [1]
        wide = [d for d in cands if d * Wq - dw_span >= 128]      # lane-dense stores if possible
        nc_lane = min(wide) if wide else max(cands)
        if NC // nc_lane < 2 and NC >= 2:                         # keep >=2 parallel steps (v7x megacore)
            smaller = [d for d in cands if NC // d >= 2]
            if smaller:
                nc_lane = max(smaller)
        nc_blocks = NC // nc_lane
        Lin = nc_lane * Wq            # input lane width per phase plane (channels packed)
        Lout = Lin - dw_span          # output lane width (valid lanes c*Wq + q, q < Wo)

        # --- replication pad + phase-split relayout (one XLA pass, no KH-fold expansion) ---
        xpad = jnp.pad(x, ((0, 0), (0, 0), (pad, pad + Hps - Hp), (pad, pad + Wps - Wp)), mode="edge")
        xph = xpad.reshape(nc_blocks, nc_lane, Hq, s, Wq, s)
        xph = jnp.transpose(xph, (0, 3, 5, 2, 1, 4))              # (g, ph, pw, hq, c, wq)
        xph = xph.reshape(nc_blocks, s * s, Hq, Lin)
        # TODO(synk): fuse this relayout (pad + column phase split) into the kernel via
        # strided/manual DMA to remove the remaining HBM round trip of the pre-pass.

        # --- in-kernel row chunking (bounds live vregs; no inter-tile halo) ---
        live_per_row = Lout * 4 + len(needed_phases) * Lin * 4
        tile_oh = max(1, LIVE_BUDGET // max(1, live_per_row))
        if tile_oh >= 8:
            tile_oh = (tile_oh // 8) * 8
        tile_oh = min(Ho, tile_oh)

        def kernel(x_ref, o_ref):
            # x_ref: (1, s*s, Hq, Lin)   o_ref: (1, Ho, Lout)
            for r0 in range(0, Ho, tile_oh):
                rows = min(tile_oh, Ho - r0)
                # One wide contiguous load per (row-phase, col-phase) per chunk.
                wins = {}
                for (ph, pw) in needed_phases:
                    wins[(ph, pw)] = x_ref[0, ph * s + pw, r0:r0 + rows + dh_span, :]
                # vreg-resident accumulation; equal-weight taps summed before the multiply.
                acc = None
                for w, taps in weight_groups:
                    gsum = None
                    for (kh, kw) in taps:
                        win = wins[(kh % s, kw % s)]
                        sl = win[kh // s:kh // s + rows, kw // s:kw // s + Lout]
                        gsum = sl if gsum is None else gsum + sl
                    term = gsum * w
                    acc = term if acc is None else acc + term
                o_ref[0, r0:r0 + rows, :] = acc   # single store per output element

        in_block = s * s * Hq * Lin * 4
        out_block = Ho * Lout * 4
        vmem_limit = min(48 * 1024 * 1024,
                         max(32 * 1024 * 1024, 2 * (in_block + out_block) + (1 << 20)))
        cost = pl.CostEstimate(
            flops=int(2 * NC * Ho * Wo * KH * KW),
            transcendentals=0,
            bytes_accessed=int(xph.size * 4 + nc_blocks * Ho * Lout * 4),
        )
        out_w = pl.pallas_call(
            kernel,
            out_shape=jax.ShapeDtypeStruct((nc_blocks, Ho, Lout), jnp.float32),
            grid=(nc_blocks,),
            in_specs=[pl.BlockSpec((1, s * s, Hq, Lin), lambda g: (g, 0, 0, 0))],
            out_specs=pl.BlockSpec((1, Ho, Lout), lambda g: (g, 0, 0)),
            compiler_params=pltpu.CompilerParams(
                dimension_semantics=("parallel",),
                vmem_limit_bytes=int(vmem_limit),
            ),
            cost_estimate=cost,
        )(xph)

        # Un-merge the channel-packed lane axis back to NCHW (small output, cheap).
        out_w = jnp.pad(out_w, ((0, 0), (0, 0), (0, Lin - Lout)))
        out = out_w.reshape(nc_blocks, Ho, nc_lane, Wq)[..., :Wo]
        out = jnp.transpose(out, (0, 2, 1, 3)).reshape(N, C, Ho, Wo)
        return out

    return forward


# ----------------------------------------------------------------------------
# Pure-JAX reference (same math, independent strided-slice formulation)
# ----------------------------------------------------------------------------
def lanczos_reference(x, factor, kernel_width, support):
    k2d = get_kernel(factor, kernel_width, support).astype(np.float32)
    KH, KW = k2d.shape
    s = int(factor)
    pad = (KH - 1) // 2 if KH % 2 == 1 else (KH - s) // 2
    xpad = jnp.pad(x.astype(jnp.float32), ((0, 0), (0, 0), (pad, pad), (pad, pad)), mode="edge")
    N, C, Hp, Wp = xpad.shape
    Ho = (Hp - KH) // s + 1
    Wo = (Wp - KW) // s + 1
    out = jnp.zeros((N, C, Ho, Wo), jnp.float32)
    for kh in range(KH):
        for kw in range(KW):
            tap = lax.slice(xpad, (0, 0, kh, kw),
                            (N, C, kh + (Ho - 1) * s + 1, kw + (Wo - 1) * s + 1),
                            (1, 1, s, s))
            out = out + float(k2d[kh, kw]) * tap
    return out


if __name__ == "__main__":
    # Module config: Lanczos(in_d=4, factor=2, kernel_width=4, support=2)
    in_d, factor, kernel_width, support = 4, 2, 4, 2
    forward = make_lanczos(in_d, factor, kernel_width, support)

    key = jax.random.PRNGKey(0)
    x = jax.random.normal(key, (2, in_d, 16, 16), dtype=jnp.float32)

    out = jax.block_until_ready(forward(x))
    # stride-2 conv of an 18x18 replication-padded 16x16 image -> 8x8
    assert out.shape == (2, in_d, 8, 8), out.shape
    assert out.dtype == jnp.float32
    ref = jax.block_until_ready(lanczos_reference(x, factor, kernel_width, support))
    assert jnp.allclose(out, ref, atol=1e-5, rtol=1e-5), float(jnp.max(jnp.abs(out - ref)))

    # Second, asymmetric shape exercises odd-size round-up padding and a different nc_lane.
    x2 = jax.random.normal(jax.random.PRNGKey(1), (1, in_d, 33, 41), dtype=jnp.float32)
    out2 = jax.block_until_ready(forward(x2))
    ref2 = jax.block_until_ready(lanczos_reference(x2, factor, kernel_width, support))
    assert out2.shape == ref2.shape, (out2.shape, ref2.shape)
    assert jnp.allclose(out2, ref2, atol=1e-5, rtol=1e-5), float(jnp.max(jnp.abs(out2 - ref2)))

    print("KERNEL_OK")
</pallas_src>

<mosaic_0001>
module attributes {stable_mosaic.version = 11 : i64} {
  func.func @kernel(%arg0: i32, %arg1: memref<1x4x9x36xf32, #tpu.memory_space<vmem>>, %arg2: memref<1x8x35xf32, #tpu.memory_space<vmem>>) attributes {dimension_semantics = [#tpu.dimension_semantics<parallel>], iteration_bounds = array<i64: 2>, scalar_prefetch = 0 : i64, scratch_operands = 0 : i64, tpu.core_type = #tpu.core_type<tc>, window_params = [{transform_indices = @transform_0, window_bounds = array<i64: 1, 4, 9, 36>}, {transform_indices = @transform_1, window_bounds = array<i64: 1, 8, 35>}]} {
    %c0 = arith.constant 0 : index
    %c0_0 = arith.constant 0 : index
    %c0_1 = arith.constant 0 : index
    %c0_2 = arith.constant 0 : index
    %0 = vector.load %arg1[%c0, %c0_0, %c0_1, %c0_2] : memref<1x4x9x36xf32, #tpu.memory_space<vmem>>, vector<1x1x9x36xf32>
    %1 = vector.shape_cast %0 : vector<1x1x9x36xf32> to vector<9x36xf32>
    %c0_3 = arith.constant 0 : index
    %c1 = arith.constant 1 : index
    %c0_4 = arith.constant 0 : index
    %c0_5 = arith.constant 0 : index
    %2 = vector.load %arg1[%c0_3, %c1, %c0_4, %c0_5] : memref<1x4x9x36xf32, #tpu.memory_space<vmem>>, vector<1x1x9x36xf32>
    %3 = vector.shape_cast %2 : vector<1x1x9x36xf32> to vector<9x36xf32>
    %c0_6 = arith.constant 0 : index
    %c2 = arith.constant 2 : index
    %c0_7 = arith.constant 0 : index
    %c0_8 = arith.constant 0 : index
    %4 = vector.load %arg1[%c0_6, %c2, %c0_7, %c0_8] : memref<1x4x9x36xf32, #tpu.memory_space<vmem>>, vector<1x1x9x36xf32>
    %5 = vector.shape_cast %4 : vector<1x1x9x36xf32> to vector<9x36xf32>
    %c0_9 = arith.constant 0 : index
    %c3 = arith.constant 3 : index
    %c0_10 = arith.constant 0 : index
    %c0_11 = arith.constant 0 : index
    %6 = vector.load %arg1[%c0_9, %c3, %c0_10, %c0_11] : memref<1x4x9x36xf32, #tpu.memory_space<vmem>>, vector<1x1x9x36xf32>
    %7 = vector.shape_cast %6 : vector<1x1x9x36xf32> to vector<9x36xf32>
    %8 = vector.extract_strided_slice %1 {offsets = [0, 0], sizes = [8, 35], strides = [1, 1]} : vector<9x36xf32> to vector<8x35xf32>
    %cst = arith.constant 1.33688467E-34 : f32
    %9 = vector.broadcast %cst : f32 to vector<8x35xf32>
    %10 = arith.mulf %8, %9 : vector<8x35xf32>
    %11 = vector.extract_strided_slice %3 {offsets = [0, 0], sizes = [8, 35], strides = [1, 1]} : vector<9x36xf32> to vector<8x35xf32>
    %12 = vector.extract_strided_slice %3 {offsets = [0, 1], sizes = [8, 35], strides = [1, 1]} : vector<9x36xf32> to vector<8x35xf32>
    %13 = arith.addf %11, %12 : vector<8x35xf32>
    %14 = vector.extract_strided_slice %5 {offsets = [0, 0], sizes = [8, 35], strides = [1, 1]} : vector<9x36xf32> to vector<8x35xf32>
    %15 = arith.addf %13, %14 : vector<8x35xf32>
    %16 = vector.extract_strided_slice %5 {offsets = [1, 0], sizes = [8, 35], strides = [1, 1]} : vector<9x36xf32> to vector<8x35xf32>
    %17 = arith.addf %15, %16 : vector<8x35xf32>
    %cst_12 = arith.constant 3.08765016E-18 : f32
    %18 = vector.broadcast %cst_12 : f32 to vector<8x35xf32>
    %19 = arith.mulf %17, %18 : vector<8x35xf32>
    %20 = arith.addf %10, %19 : vector<8x35xf32>
    %21 = vector.extract_strided_slice %1 {offsets = [0, 1], sizes = [8, 35], strides = [1, 1]} : vector<9x36xf32> to vector<8x35xf32>
    %22 = vector.extract_strided_slice %1 {offsets = [1, 0], sizes = [8, 35], strides = [1, 1]} : vector<9x36xf32> to vector<8x35xf32>
    %23 = arith.addf %21, %22 : vector<8x35xf32>
    %cst_13 = arith.constant 5.38707247E-18 : f32
    %24 = vector.broadcast %cst_13 : f32 to vector<8x35xf32>
    %25 = arith.mulf %23, %24 : vector<8x35xf32>
    %26 = arith.addf %20, %25 : vector<8x35xf32>
    %27 = vector.extract_strided_slice %7 {offsets = [0, 0], sizes = [8, 35], strides = [1, 1]} : vector<9x36xf32> to vector<8x35xf32>
    %28 = vector.extract_strided_slice %7 {offsets = [0, 1], sizes = [8, 35], strides = [1, 1]} : vector<9x36xf32> to vector<8x35xf32>
    %29 = arith.addf %27, %28 : vector<8x35xf32>
    %30 = vector.extract_strided_slice %7 {offsets = [1, 0], sizes = [8, 35], strides = [1, 1]} : vector<9x36xf32> to vector<8x35xf32>
    %31 = arith.addf %29, %30 : vector<8x35xf32>
    %32 = vector.extract_strided_slice %7 {offsets = [1, 1], sizes = [8, 35], strides = [1, 1]} : vector<9x36xf32> to vector<8x35xf32>
    %33 = arith.addf %31, %32 : vector<8x35xf32>
    %cst_14 = arith.constant 0.0713119358 : f32
    %34 = vector.broadcast %cst_14 : f32 to vector<8x35xf32>
    %35 = arith.mulf %33, %34 : vector<8x35xf32>
    %36 = arith.addf %26, %35 : vector<8x35xf32>
    %37 = vector.extract_strided_slice %5 {offsets = [0, 1], sizes = [8, 35], strides = [1, 1]} : vector<9x36xf32> to vector<8x35xf32>
    %38 = vector.extract_strided_slice %3 {offsets = [1, 0], sizes = [8, 35], strides = [1, 1]} : vector<9x36xf32> to vector<8x35xf32>
    %39 = arith.addf %37, %38 : vector<8x35xf32>
    %40 = vector.extract_strided_slice %3 {offsets = [1, 1], sizes = [8, 35], strides = [1, 1]} : vector<9x36xf32> to vector<8x35xf32>
    %41 = arith.addf %39, %40 : vector<8x35xf32>
    %42 = vector.extract_strided_slice %5 {offsets = [1, 1], sizes = [8, 35], strides = [1, 1]} : vector<9x36xf32> to vector<8x35xf32>
    %43 = arith.addf %41, %42 : vector<8x35xf32>
    %cst_15 = arith.constant 0.124419078 : f32
    %44 = vector.broadcast %cst_15 : f32 to vector<8x35xf32>
    %45 = arith.mulf %43, %44 : vector<8x35xf32>
    %46 = arith.addf %36, %45 : vector<8x35xf32>
    %47 = vector.extract_strided_slice %1 {offsets = [1, 1], sizes = [8, 35], strides = [1, 1]} : vector<9x36xf32> to vector<8x35xf32>
    %cst_16 = arith.constant 0.217075959 : f32
    %48 = vector.broadcast %cst_16 : f32 to vector<8x35xf32>
    %49 = arith.mulf %47, %48 : vector<8x35xf32>
    %50 = arith.addf %46, %49 : vector<8x35xf32>
    %c0_17 = arith.constant 0 : index
    %c0_18 = arith.constant 0 : index
    %c0_19 = arith.constant 0 : index
    %51 = vector.load %arg2[%c0_17, %c0_18, %c0_19] : memref<1x8x35xf32, #tpu.memory_space<vmem>>, vector<1x8x35xf32>
    %52 = vector.shape_cast %51 : vector<1x8x35xf32> to vector<8x35xf32>
    %53 = vector.shape_cast %50 : vector<8x35xf32> to vector<1x8x35xf32>
    tpu.vector_store %arg2[%c0_17, %c0_18, %c0_19], %53 {strides = array<i32>} : memref<1x8x35xf32, #tpu.memory_space<vmem>>, vector<1x8x35xf32>,
    return
  }
  func.func @transform_0(%arg0: i32) -> (i32, i32, i32, i32) {
    %c0_i32 = arith.constant 0 : i32
    %c0_i32_0 = arith.constant 0 : i32
    %c0_i32_1 = arith.constant 0 : i32
    %c0_i32_2 = arith.constant 0 : i32
    return %arg0, %c0_i32, %c0_i32_0, %c0_i32_1 : i32, i32, i32, i32
  }
  func.func @transform_1(%arg0: i32) -> (i32, i32, i32) {
    %c0_i32 = arith.constant 0 : i32
    %c0_i32_0 = arith.constant 0 : i32
    %c0_i32_1 = arith.constant 0 : i32
    return %arg0, %c0_i32, %c0_i32_0 : i32, i32, i32
  }
}

</mosaic_0001>

<bundles_post_ra>
// kernel: forward.1
= control target key start
LH: loop header
LB: loop body
LE: loop exit
PB: predicated region body
PF: predicated region fallthrough
CT: control target
= control target key end

     0   :  { %s305_s6 = smov 0   ;;  %s337_s0 = inlined_call_operand.vmem [shape: f32[2,4,9,36], index: 0, kind: input, shape index: {}]   ;;  %s338_s1 = inlined_call_operand.vmem [shape: f32[2,8,35], index: 1, kind: output, shape index: {}]  }
   0x1 LB: > { %s258_s7 = sadd.s32 4294967295, %s291_s6   ;;  %p262_p0 = scmp.ge.s32.totalorder %s291_s6, 1  ;;  %s291_s6 = sphi %s305_s6, %s11_s6  }
   0x2   : > { %p87_p1 = scmp.lt.s32.totalorder %s291_s6, 3 }
   0x4   : > { %p88_p2 = pnand %p262_p0, %p87_p1 }
   0x5   : > { %p106_p3 = scmp.lt.s32.totalorder (!%p88_p2), %s258_s7, 1  ;;  %vm135_vm0 = vcmask (!%p88_p2), 1046528   ;;  %s293_s12 = smov (!%p88_p2), 127   ;;  %vm203_vm1 = vcmask (!%p88_p2), 285696  }
   0x6   : > { %91 = sbr.rel (%p88_p2) target bundleno = 267 (0x10b), region = 24  ;;  %s294_s13 = smov (!%p88_p2), 1  }
   0xd   : > { %s340_s7 = smov (!%p106_p3, %s258_s7), 1 }
   0xe   : > { %s274_s8 = sshll.u32 %s340_s7, 6  ;;  %s265_s14 = sshll.u32 %s340_s7, 3 }
   0xf   : > { %s110_s11 = scalar_lea.vmem %s337_s0, %s274_s8  ;;  %s114_s17 = scalar_lea.vmem %s338_s1, %s265_s14 }
  0x10   : > { %v115_v0 = vld [vmem:[%s110_s11] sm:$0xff]  ;;  %v116_v1 = vld [vmem:[%s110_s11 + $0x8] sm:$0x1]  ;;  %v266_v2 = vld [vmem:[%s110_s11 + $0x10] sm:$0xff] }
  0x11   : > { %v145_v3 = vrot.slane %v115_v0, 1  ;;  %v146_v4 = vrot.slane %v116_v1, 1  ;;  %v267_v5 = vld [vmem:[%s110_s11 + $0x18] sm:$0x1]  ;;  %v176_v6 = vrot.slane %v266_v2, 1  ;;  %128 = vrot.lane.b32.xlu1 %v266_v2, %s293_s12  ;;  %v270_v8 = vld [vmem:[%s110_s11 + $0x30] sm:$0xff] }
  0x12   : > { %v177_v7 = vrot.slane %v267_v5, 1  ;;  %v271_v9 = vld [vmem:[%s110_s11 + $0x38] sm:$0x1]  ;;  %v268_v10 = vld [vmem:[%s110_s11 + $0x20] sm:$0xff]  ;;  %v269_v13 = vld [vmem:[%s110_s11 + $0x28] sm:$0x1] }
  0x13   : > { %v147_v11 = vsel %vm135_vm0, %v145_v3, %v146_v4  ;;  %v136_v12 = vrot.slane %v268_v10, 1  ;;  %v192_v14 = vmul.f32 0.21707596, %v115_v0  ;;  %v137_v15 = vrot.slane %v269_v13, 1 }
  0x14   : > { %148 = vrot.lane.b32.xlu0 %v147_v11, %s294_s13  ;;  %v193_v16 = vmul.f32 0.21707596, %v116_v1  ;;  %v178_v17 = vsel %vm135_vm0, %v176_v6, %v177_v7  ;;  %v164_v18 = vrot.slane %v270_v8, 1  ;;  %v165_v19 = vrot.slane %v271_v9, 1 }
  0x15   : > { %159 = vrot.lane.b32.xlu1 %v270_v8, %s293_s12  ;;  %v196_v20 = vrot.slane %v192_v14, 1  ;;  %v138_v21 = vsel %vm135_vm0, %v136_v12, %v137_v15  ;;  %v126_v41 = vmul.f32 1.3368847e-34, %v115_v0 }
  0x16   : > { %v197_v22 = vrot.slane %v193_v16, 1  ;;  %v166_v24 = vsel %vm135_vm0, %v164_v18, %v165_v19 }
  0x18   : > { %179 = vrot.lane.b32.xlu0 %v178_v17, %s294_s13  ;;  %v198_v23 = vsel %vm135_vm0, %v196_v20, %v197_v22 }
  0x1c   : > { %169 = vrot.lane.b32.xlu0 %v166_v24, %s293_s12 }
  0x83   : > { %v129_v33 = vpop.permute.xlu1 %128 }
  0x84   : > { %v131_v34 = vadd.f32 %v266_v2, %v129_v33 }
  0x86   : > { %v149_v25 = vpop.permute.xlu0 %148  ;;  %v132_v35 = vadd.f32 %v268_v10, %v131_v34 }
  0x87   : > { %v151_v26 = vadd.f32 %v149_v25, %v115_v0  ;;  %v160_v36 = vpop.permute.xlu1 %159 }
  0x88   : > { %v140_v37 = vadd.f32 %v138_v21, %v132_v35  ;;  %v162_v38 = vadd.f32 %v270_v8, %v160_v36 }
  0x89   : > { %v152_v27 = vmul.f32 5.3870725e-18, %v151_v26 }
  0x8a   : > { %v180_v28 = vpop.permute.xlu0 %179  ;;  %v168_v39 = vadd.f32 %v166_v24, %v162_v38  ;;  %v141_v40 = vmul.f32 3.0876502e-18, %v140_v37 }
  0x8b   : > { %v182_v29 = vadd.f32 %v268_v10, %v180_v28  ;;  %154 = vrot.lane.b32.xlu1 %v152_v27, %s293_s12 }
  0x8c   : > { %v142_v44 = vadd.f32 %v141_v40, %v126_v41 }
  0x8d   : > { %v184_v30 = vadd.f32 %v182_v29, %v178_v17 }
  0x8e   : > { %v170_v42 = vpop.permute.xlu0 %169 }
  0x8f   : > { %v185_v31 = vadd.f32 %v184_v30, %v138_v21  ;;  %199 = vrot.lane.b32.xlu1 %v198_v23, %s293_s12  ;;  %v172_v43 = vadd.f32 %v170_v42, %v168_v39 }
  0x91   : > { %v186_v32 = vmul.f32 0.12441908, %v185_v31  ;;  %v173_v46 = vmul.f32 0.071311936, %v172_v43 }
  0x93   : > { %188 = vrot.lane.b32.xlu0 %v186_v32, %s293_s12 }
  0xfd   : > { %v155_v45 = vpop.permute.xlu1 %154 }
  0xfe   : > { %v157_v47 = vadd.f32 %v155_v45, %v142_v44 }
 0x100   : > { %v174_v48 = vadd.f32 %v173_v46, %v157_v47 }
 0x101   : > { %v200_v50 = vpop.permute.xlu1 %199 }
 0x105   : > { %v189_v49 = vpop.permute.xlu0 %188 }
 0x106   : > { %v191_v51 = vadd.f32 %v189_v49, %v174_v48 }
 0x108   : > { %v202_v52 = vadd.f32 %v200_v50, %v191_v51 }
 0x10a   : > { %204 = vst.msk [vmem:[%s114_s17] sm:$0xff] %vm203_vm1, %v202_v52 }
 0x10b PF: > { %s11_s6 = sadd.s32 1, %s291_s6  }
 0x10c   : > { %p8_p4 = scmp.ge.s32.totalorder %s11_s6, 4  }
 0x10e   :  { %10 = sbr.rel (!%p8_p4) target bundleno = 1 (0x1), region = 57 }

</bundles_post_ra>
